<compile_context>
chip_gen: v7x
topology: tpu7x:2x2x1
jax: 0.10.0
libtpu: 0.0.40
codegen_flags: <defaults>
</compile_context>

<pallas_src>
import functools

import jax
import jax.numpy as jnp
from jax.experimental import pallas as pl
from jax.experimental.pallas import tpu as pltpu

# ---------------- configuration (the "opts") ----------------
NUM_NONTERMINALS = 16    # len(nonterminals)  -> one-hot feature dim F
EMBEDDING_DIM = 32       # opts.embedding_dim -> D
HOPS = 2                 # opts.hops          -> K of SGConv
NUM_MESSAGE_LAYERS = 2   # opts.num_message_layers
POOLING = "mean"         # opts.pooling (dropout: eval mode -> identity)

D_PAD = 128              # embedding dim padded to one vreg lane width
G_PAD = 8                # graph count padded to one sublane group
TILE = 128               # row / reduction tile for the node dimension
VMEM_LIMIT = 32 * 1024 * 1024   # safe scoped-VMEM budget on v5e/v6e/v7x


# ==================== kernel 1: tiled bf16 matmul (A^K) ====================
def _matmul_kernel(a_ref, b_ref, o_ref, acc_ref):
    @pl.when(pl.program_id(2) == 0)
    def _():
        acc_ref[...] = jnp.zeros_like(acc_ref)

    acc_ref[...] += jnp.dot(a_ref[...], b_ref[...],
                            preferred_element_type=jnp.float32)

    @pl.when(pl.program_id(2) == pl.num_programs(2) - 1)
    def _():
        o_ref[...] = acc_ref[...].astype(o_ref.dtype)


def matmul_bf16(a, b, *, tm=TILE, tn=TILE, tk=TILE, out_dtype=jnp.bfloat16):
    m, k = a.shape
    _, n = b.shape
    assert m % tm == 0 and n % tn == 0 and k % tk == 0
    return pl.pallas_call(
        _matmul_kernel,
        out_shape=jax.ShapeDtypeStruct((m, n), out_dtype),
        grid_spec=pltpu.PrefetchScalarGridSpec(
            num_scalar_prefetch=0,
            grid=(m // tm, n // tn, k // tk),
            in_specs=[pl.BlockSpec((tm, tk), lambda i, j, kk: (i, kk)),
                      pl.BlockSpec((tk, tn), lambda i, j, kk: (kk, j))],
            out_specs=pl.BlockSpec((tm, tn), lambda i, j, kk: (i, j)),
            scratch_shapes=[pltpu.VMEM((tm, tn), jnp.float32)]),
        compiler_params=pltpu.CompilerParams(
            dimension_semantics=("parallel", "parallel", "arbitrary"),
            vmem_limit_bytes=VMEM_LIMIT),
    )(a, b)


# ============ kernel 2: fused SG message layer  Y = tanh(A^K H + b)[@Wnext] ============
def _sg_layer_kernel_post(a_ref, h_ref, b_ref, w_ref, o_ref, acc_ref):
    k = pl.program_id(1)

    @pl.when(k == 0)
    def _():
        acc_ref[...] = jnp.zeros_like(acc_ref)

    acc_ref[...] += jnp.dot(a_ref[...], h_ref[...],
                            preferred_element_type=jnp.float32)

    @pl.when(k == pl.num_programs(1) - 1)
    def _():
        y = jnp.tanh(acc_ref[...] + b_ref[...])                 # f32 epilogue
        # Fold the NEXT layer's linear in here: A^K (H W) == (A^K H) W.
        y = jnp.dot(y.astype(jnp.bfloat16), w_ref[...],
                    preferred_element_type=jnp.float32)
        o_ref[...] = y.astype(o_ref.dtype)


def _sg_layer_kernel_nopost(a_ref, h_ref, b_ref, o_ref, acc_ref):
    k = pl.program_id(1)

    @pl.when(k == 0)
    def _():
        acc_ref[...] = jnp.zeros_like(acc_ref)

    acc_ref[...] += jnp.dot(a_ref[...], h_ref[...],
                            preferred_element_type=jnp.float32)

    @pl.when(k == pl.num_programs(1) - 1)
    def _():
        y = jnp.tanh(acc_ref[...] + b_ref[...])                 # f32 epilogue
        o_ref[...] = y.astype(o_ref.dtype)


def sg_layer(a_pow, h, bias, w_post=None, *, tm=TILE, tk=TILE,
             out_dtype=jnp.bfloat16):
    n = a_pow.shape[0]
    d = h.shape[1]
    assert n % tm == 0 and n % tk == 0

    in_specs = [
        pl.BlockSpec((tm, tk), lambda i, k: (i, k)),   # A^K row-block x red-block
        pl.BlockSpec((tk, d), lambda i, k: (k, 0)),    # H reduction block (lane-dense)
        pl.BlockSpec((1, d), lambda i, k: (0, 0)),     # bias (f32, full)
    ]
    args = [a_pow, h, bias]
    if w_post is not None:
        in_specs.append(pl.BlockSpec((d, d), lambda i, k: (0, 0)))
        args.append(w_post)
        kernel = _sg_layer_kernel_post
    else:
        kernel = _sg_layer_kernel_nopost

    return pl.pallas_call(
        kernel,
        out_shape=jax.ShapeDtypeStruct((n, d), out_dtype),
        grid_spec=pltpu.PrefetchScalarGridSpec(
            num_scalar_prefetch=0,
            grid=(n // tm, n // tk),                   # reduction axis last
            in_specs=in_specs,
            out_specs=pl.BlockSpec((tm, d), lambda i, k: (i, 0)),
            scratch_shapes=[pltpu.VMEM((tm, d), jnp.float32)]),
        compiler_params=pltpu.CompilerParams(
            dimension_semantics=("parallel", "arbitrary"),
            vmem_limit_bytes=VMEM_LIMIT),
    )(*args)


# ==================== kernel 3: global mean pool ====================
def _pool_kernel(p_ref, h_ref, o_ref, acc_ref):
    k = pl.program_id(0)

    @pl.when(k == 0)
    def _():
        acc_ref[...] = jnp.zeros_like(acc_ref)

    acc_ref[...] += jnp.dot(p_ref[...], h_ref[...],
                            preferred_element_type=jnp.float32)

    @pl.when(k == pl.num_programs(0) - 1)
    def _():
        o_ref[...] = acc_ref[...]


def mean_pool(pool_mat, h, *, tk=TILE):
    g, n = pool_mat.shape
    d = h.shape[1]
    assert n % tk == 0
    return pl.pallas_call(
        _pool_kernel,
        out_shape=jax.ShapeDtypeStruct((g, d), jnp.float32),
        grid_spec=pltpu.PrefetchScalarGridSpec(
            num_scalar_prefetch=0,
            grid=(n // tk,),
            in_specs=[pl.BlockSpec((g, tk), lambda k: (0, k)),
                      pl.BlockSpec((tk, d), lambda k: (k, 0))],
            out_specs=pl.BlockSpec((g, d), lambda k: (0, 0)),
            scratch_shapes=[pltpu.VMEM((g, d), jnp.float32)]),
        compiler_params=pltpu.CompilerParams(
            dimension_semantics=("arbitrary",),
            vmem_limit_bytes=VMEM_LIMIT),
    )(pool_mat, h)


# ==================== full forward (padded) ====================
def sg_embedder_forward(a_hat_pad, node_types_pad, w1_pad, b1_pad,
                        w2_pad, b2_pad, pool_mat_pad, *, tile=TILE):
    """Padded SGEmbedder forward.  Returns [G_PAD, D_PAD] f32 (slice outside).

    a_hat_pad     : [Np, Np] f32  normalized adjacency, zero on padding
    node_types_pad: [Np]     i32  nonterminal index per node (pad = 0)
    w1_pad/b1_pad : [F, Dp] / [1, Dp]   SGConv #1 linear (zero-padded lanes)
    w2_pad/b2_pad : [Dp, Dp] / [1, Dp]  SGConv #2 linear (zero-padded)
    pool_mat_pad  : [G_PAD, Np] f32     mean-pool matrix, zero on padding
    """
    # ---- A_hat^HOPS, computed once in bf16 and reused by both layers ----
    a_bf16 = a_hat_pad.astype(jnp.bfloat16)
    a_pow = a_bf16
    for _ in range(HOPS - 1):
        a_pow = matmul_bf16(a_pow, a_bf16, tm=tile, tn=tile, tk=tile)

    # ---- layer-1 input: one_hot(types) @ W1 == W1[types] (embedding lookup) ----
    h = w1_pad.astype(jnp.bfloat16)[node_types_pad]          # [Np, Dp] bf16

    # ---- message layers (tanh activation, eval-mode dropout = identity) ----
    # layer l output feeds layer l+1; the next layer's linear W is folded into
    # the previous layer's epilogue so each layer is a single propagation pass.
    biases = [b1_pad, b2_pad]
    posts = [w2_pad.astype(jnp.bfloat16), None]
    for l in range(NUM_MESSAGE_LAYERS):
        last = l == NUM_MESSAGE_LAYERS - 1
        h = sg_layer(a_pow, h, biases[l], posts[l], tm=tile, tk=tile,
                     out_dtype=jnp.float32 if last else jnp.bfloat16)

    # ---- global mean pool ----
    return mean_pool(pool_mat_pad, h, tk=tile)
    # TODO(synk): 'set2set' / 'sort' pooling variants (LSTM / top-k sort) and
    # the 1- / 4-layer configs are not wired up; only the 2-layer mean-pool
    # configuration of the module is implemented here.


# ---------------- glue: graph construction (host-side in the original) ----
def build_dense_normalized_adjacency(edge_index, num_nodes):
    """A_hat = D^-1/2 (A + I) D^-1/2  (gcn_norm with self loops, as SGConv)."""
    src, dst = edge_index
    adj = jnp.zeros((num_nodes, num_nodes), jnp.float32).at[src, dst].set(1.0)
    adj = adj + jnp.eye(num_nodes, dtype=jnp.float32)
    deg = adj.sum(axis=1)
    dinv = jnp.where(deg > 0, 1.0 / jnp.sqrt(deg), 0.0)
    return dinv[:, None] * adj * dinv[None, :]


def build_mean_pool_matrix(batch_vec, num_graphs):
    onehot = (batch_vec[None, :] == jnp.arange(num_graphs)[:, None]).astype(jnp.float32)
    counts = onehot.sum(axis=1, keepdims=True)
    return onehot / jnp.maximum(counts, 1.0)


# ---------------- pure-JAX f32 reference for a correctness check -----------
def reference(a_hat, x, w1, b1, w2, b2, pool_mat):
    h = x
    for _ in range(HOPS):
        h = a_hat @ h
    h = jnp.tanh(h @ w1 + b1)
    for _ in range(HOPS):
        h = a_hat @ h
    h = jnp.tanh(h @ w2 + b2)
    return pool_mat @ h


if __name__ == "__main__":
    key = jax.random.PRNGKey(0)
    k_types, k_w1, k_b1, k_w2, k_b2 = jax.random.split(key, 5)

    # Two synthetic ASTs, 8 nodes each (16 real nodes in the batched graph).
    nodes_per_graph = 8
    num_graphs = 2
    N = nodes_per_graph * num_graphs
    F = NUM_NONTERMINALS
    D = EMBEDDING_DIM
    N_PAD = 256                       # multiple of TILE (and of 2x128 MXU tiles)

    # Synthetic tree per graph (parent->child), made bidirectional as in
    # create_edge_index.
    tree_edges = [(0, 1), (0, 2), (1, 3), (1, 4), (2, 5), (2, 6), (5, 7)]
    src_list, dst_list = [], []
    for g in range(num_graphs):
        off = g * nodes_per_graph
        for p, c in tree_edges:
            src_list += [p + off, c + off]
            dst_list += [c + off, p + off]
    edge_index = jnp.array([src_list, dst_list], dtype=jnp.int32)

    # Node types (one_hot_encode indexes into nonterminals).
    node_types = jax.random.randint(k_types, (N,), 0, F).astype(jnp.int32)
    x = jax.nn.one_hot(node_types, F, dtype=jnp.float32)

    # Which graph each node belongs to.
    batch_vec = jnp.repeat(jnp.arange(num_graphs), nodes_per_graph)

    a_hat = build_dense_normalized_adjacency(edge_index, N)
    pool_mat = build_mean_pool_matrix(batch_vec, num_graphs)

    # SGConv linear parameters (W [F_in, D], b [1, D]).
    w1 = jax.random.normal(k_w1, (F, D), jnp.float32) * 0.1
    b1 = jax.random.normal(k_b1, (1, D), jnp.float32) * 0.01
    w2 = jax.random.normal(k_w2, (D, D), jnp.float32) * 0.1
    b2 = jax.random.normal(k_b2, (1, D), jnp.float32) * 0.01

    # ---- pad everything to MXU/vreg-friendly shapes (zeros on padding) ----
    a_pad = jnp.zeros((N_PAD, N_PAD), jnp.float32).at[:N, :N].set(a_hat)
    pool_pad = jnp.zeros((G_PAD, N_PAD), jnp.float32).at[:num_graphs, :N].set(pool_mat)
    types_pad = jnp.zeros((N_PAD,), jnp.int32).at[:N].set(node_types)
    w1_pad = jnp.zeros((F, D_PAD), jnp.float32).at[:, :D].set(w1)
    b1_pad = jnp.zeros((1, D_PAD), jnp.float32).at[:, :D].set(b1)
    w2_pad = jnp.zeros((D_PAD, D_PAD), jnp.float32).at[:D, :D].set(w2)
    b2_pad = jnp.zeros((1, D_PAD), jnp.float32).at[:, :D].set(b2)

    out_full = sg_embedder_forward(a_pad, types_pad, w1_pad, b1_pad,
                                   w2_pad, b2_pad, pool_pad)
    out_full = jax.block_until_ready(out_full)
    out = out_full[:num_graphs, :D]

    ref = reference(a_hat, x, w1, b1, w2, b2, pool_mat)
    assert out.shape == (num_graphs, D)
    # bf16 matmul operands (f32 accumulate) -> loosened tolerance vs f32 ref.
    max_err = float(jnp.max(jnp.abs(out - ref)))
    assert jnp.allclose(out, ref, atol=5e-2, rtol=5e-2), \
        f"mismatch vs reference (max abs err {max_err})"

    print("KERNEL_OK")
</pallas_src>

<mosaic_0001>
module attributes {stable_mosaic.version = 11 : i64} {
  func.func @_matmul_kernel(%arg0: i32, %arg1: i32, %arg2: i32, %arg3: memref<128x128xbf16, #tpu.memory_space<vmem>>, %arg4: memref<128x128xbf16, #tpu.memory_space<vmem>>, %arg5: memref<128x128xbf16, #tpu.memory_space<vmem>>, %arg6: memref<128x128xf32, #tpu.memory_space<vmem>>) attributes {dimension_semantics = [#tpu.dimension_semantics<parallel>, #tpu.dimension_semantics<parallel>, #tpu.dimension_semantics<arbitrary>], iteration_bounds = array<i64: 2, 2, 2>, scalar_prefetch = 0 : i64, scratch_operands = 1 : i64, tpu.core_type = #tpu.core_type<tc>, window_params = [{transform_indices = @transform_0, window_bounds = array<i64: 128, 128>}, {transform_indices = @transform_1, window_bounds = array<i64: 128, 128>}, {transform_indices = @transform_2, window_bounds = array<i64: 128, 128>}]} {
    %c0_i32 = arith.constant 0 : i32
    %0 = arith.cmpi eq, %arg2, %c0_i32 : i32
    %1 = arith.extui %0 : i1 to i32
    %c0_i32_0 = arith.constant 0 : i32
    %2 = arith.cmpi ne, %1, %c0_i32_0 : i32
    scf.if %2 {
      %cst_9 = arith.constant 0.000000e+00 : f32
      %12 = vector.broadcast %cst_9 : f32 to vector<128x128xf32>
      %c0_10 = arith.constant 0 : index
      %c0_11 = arith.constant 0 : index
      %13 = vector.load %arg6[%c0_10, %c0_11] : memref<128x128xf32, #tpu.memory_space<vmem>>, vector<128x128xf32>
      tpu.vector_store %arg6[%c0_10, %c0_11], %12 {strides = array<i32>} : memref<128x128xf32, #tpu.memory_space<vmem>>, vector<128x128xf32>,
    } else {
    }
    %c0 = arith.constant 0 : index
    %c0_1 = arith.constant 0 : index
    %3 = vector.load %arg6[%c0, %c0_1] : memref<128x128xf32, #tpu.memory_space<vmem>>, vector<128x128xf32>
    %c0_2 = arith.constant 0 : index
    %c0_3 = arith.constant 0 : index
    %4 = vector.load %arg3[%c0_2, %c0_3] : memref<128x128xbf16, #tpu.memory_space<vmem>>, vector<128x128xbf16>
    %c0_4 = arith.constant 0 : index
    %c0_5 = arith.constant 0 : index
    %5 = vector.load %arg4[%c0_4, %c0_5] : memref<128x128xbf16, #tpu.memory_space<vmem>>, vector<128x128xbf16>
    %cst = arith.constant dense<0.000000e+00> : vector<128x128xf32>
    %6 = tpu.matmul %4, %5, %cst {dimension_numbers = #tpu.dot_dimension_numbers<[1], [0], [0], [1], [0, 0, 1, 1], [], []>} : vector<128x128xbf16>, vector<128x128xbf16>, vector<128x128xf32> -> vector<128x128xf32>
    %7 = arith.addf %3, %6 : vector<128x128xf32>
    %c0_6 = arith.constant 0 : index
    %c0_7 = arith.constant 0 : index
    %8 = vector.load %arg6[%c0_6, %c0_7] : memref<128x128xf32, #tpu.memory_space<vmem>>, vector<128x128xf32>
    tpu.vector_store %arg6[%c0_6, %c0_7], %7 {strides = array<i32>} : memref<128x128xf32, #tpu.memory_space<vmem>>, vector<128x128xf32>,
    %c1_i32 = arith.constant 1 : i32
    %9 = arith.cmpi eq, %arg2, %c1_i32 : i32
    %10 = arith.extui %9 : i1 to i32
    %c0_i32_8 = arith.constant 0 : i32
    %11 = arith.cmpi ne, %10, %c0_i32_8 : i32
    scf.if %11 {
      %c0_9 = arith.constant 0 : index
      %c0_10 = arith.constant 0 : index
      %12 = vector.load %arg6[%c0_9, %c0_10] : memref<128x128xf32, #tpu.memory_space<vmem>>, vector<128x128xf32>
      %13 = arith.truncf %12 : vector<128x128xf32> to vector<128x128xbf16>
      %c0_11 = arith.constant 0 : index
      %c0_12 = arith.constant 0 : index
      %14 = vector.load %arg5[%c0_11, %c0_12] : memref<128x128xbf16, #tpu.memory_space<vmem>>, vector<128x128xbf16>
      tpu.vector_store %arg5[%c0_11, %c0_12], %13 {strides = array<i32>} : memref<128x128xbf16, #tpu.memory_space<vmem>>, vector<128x128xbf16>,
    } else {
    }
    return
  }
  func.func @transform_0(%arg0: i32, %arg1: i32, %arg2: i32) -> (i32, i32) {
    %c0_i32 = arith.constant 0 : i32
    return %arg0, %arg2 : i32, i32
  }
  func.func @transform_1(%arg0: i32, %arg1: i32, %arg2: i32) -> (i32, i32) {
    %c0_i32 = arith.constant 0 : i32
    return %arg2, %arg1 : i32, i32
  }
  func.func @transform_2(%arg0: i32, %arg1: i32, %arg2: i32) -> (i32, i32) {
    %c0_i32 = arith.constant 0 : i32
    return %arg0, %arg1 : i32, i32
  }
}

</mosaic_0001>

<bundles_post_ra>
// kernel: tpu_custom_call.1
= control target key start
LH: loop header
LB: loop body
LE: loop exit
PB: predicated region body
PF: predicated region fallthrough
CT: control target
= control target key end

     0   :  { %s1792_s0 = inlined_call_operand.hbm [shape: bf16[256,256], index: 0, kind: input, shape index: {}]   ;;  %s1793_s1 = inlined_call_operand.hbm [shape: bf16[256,256], index: 1, kind: input, shape index: {}]   ;;  %s1794_s2 = inlined_call_operand.hbm [shape: bf16[256,256], index: 2, kind: output, shape index: {}]  }
   0x1   :  { %1812 = sst [smem:[#allocation18_spill]] %s1792_s0 }
   0x2   :  { %1813 = sst [smem:[#allocation19_spill]] %s1793_s1 }
   0x3   :  { %1814 = sst [smem:[#allocation20_spill]] %s1794_s2 }
   0x4   :  { %7 = vsyncpa [#allocation4], 0 }
   0x5   :  { %9 = vsyncpa [#allocation4 + $0x1], 0 }
   0x6   :  { %10 = vsyncpa [#allocation7], 0 }
   0x7   :  { %12 = vsyncpa [#allocation7 + $0x1], 0 }
   0x8   :  { %13 = vsyncpa [#allocation5], 0 }
   0x9   :  { %15 = vsyncpa [#allocation5 + $0x1], 0  ;;  %s1372_s9 = smov 0   ;;  %s1374_s10 = smov 0  }
   0xa   :  { %s1376_s11 = smov 0   ;;  %s1378_s12 = smov 0  }
   0xb   :  { %s1380_s13 = smov 0   ;;  %s1382_s14 = smov 0  }
   0xc   :  { %s1384_s15 = smov 0   ;;  %s1386_s16 = smov 0  }
   0xd   :  { %s1388_s17 = smov 0   ;;  %s1390_s18 = smov 0  }
   0xe   :  { %s1392_s19 = smov 0   ;;  %s1394_s20 = smov 0  }
   0xf   :  { %s1396_s21 = smov 0   ;;  %s1398_s22 = smov 0  }
  0x10   :  { %s1400_s23 = smov 0   ;;  %s1402_s24 = smov 0  }
  0x11 LB: > { %1815 = sst [smem:[#allocation12_spill]] %s1325_s19  ;;  %s33_s25 = sadd.s32 1, %s1333_s21  ;;  %s1345_s24 = sphi %s1402_s24, %s21_s24   ;;  %s1341_s23 = sphi %s1400_s23, %s1853_s23   ;;  %s1337_s22 = sphi %s1398_s22, %s1866_s22   ;;  %s1333_s21 = sphi %s1396_s21, %s1865_s21   ;;  %s1329_s20 = sphi %s1394_s20, %s1850_s20   ;;  %s1325_s19 = sphi %s1392_s19, %s1864_s19   ;;  %s1321_s18 = sphi %s1390_s18, %s1863_s18   ;;  %s1317_s17 = sphi %s1388_s17, %s1862_s17   ;;  %s1313_s16 = sphi %s1386_s16, %s1861_s16   ;;  %s1309_s15 = sphi %s1384_s15, %s1860_s15   ;;  %s1305_s14 = sphi %s1382_s14, %s1859_s14   ;;  %s1301_s13 = sphi %s1380_s13, %s1858_s13   ;;  %s1297_s12 = sphi %s1378_s12, %s1857_s12   ;;  %s1293_s11 = sphi %s1376_s11, %s1856_s11   ;;  %s1289_s10 = sphi %s1374_s10, %s1855_s10   ;;  %s1285_s9 = sphi %s1372_s9, %s1854_s9  }
  0x12   : > { %1816 = sst [smem:[#allocation13_spill]] %s1341_s23  ;;  %s1795_s26 = sadd.s32 4294967295, %s1345_s24  }
  0x13   : > { %p1452_p0 = scmp.ge.s32.totalorder %s33_s25, 2  ;;  %p56_p1 = scmp.ne.s32.totalorder %s1317_s17, %s1313_s16 }
  0x14   : > { %p1799_p2 = scmp.eq.s32.totalorder %s1345_s24, 0  ;;  %p62_p3 = scmp.ne.s32.totalorder %s1313_s16, %s1309_s15 }
  0x15   : > { %s1868_s25 = smov (%p1452_p0, %s33_s25), 0  ;;  %p1468_p4 = scmp.eq.s32.totalorder %s1795_s26, 0 }
  0x16   : > { %1818 = sst [smem:[#allocation14_spill]] %s1868_s25  ;;  %s1474_s3 = ssub.s32 %s1333_s21, %s1868_s25 }
  0x17   : > { %s1819_s30 = scalar_select %p1468_p4, 1, 0 }
  0x18   : > { %p58_p5 = por %p1799_p2, %p56_p1  ;;  %p1480_p6 = por %p1468_p4, %p62_p3 }
  0x19   : > { %p1798_p7 = scmp.lt.s32.totalorder %s1345_s24, 8  ;;  %s142_s5 = sand.u32 1, %s1317_s17  }
  0x1a   : > { %s1820_s4 = scalar_select %p1480_p6, 1, 0 }
  0x1b   : > { %s767_s6 = sshll.u32 %s142_s5, 6  ;;  %s819_s7 = sshll.u32 %s1341_s23, 5 }
  0x1c   : > { %s152_s8 = sadd.s32 %s1333_s21, %s819_s7  ;;  %s146_s15 = scalar_lea.vmem [#allocation3], %s767_s6 }
  0x1d   : > { %s155_s29 = sshll.u32 %s146_s15, 4  ;;  %s770_s28 = sshll.u32 %s152_s8, 6  ;;  %s1488_s29 = int_to_ptr.vmem [resolvable:$true] %s155_s29 }
  0x1e   : > { %s1821_s0 = sld [smem:[#allocation18_spill]]  ;;  %p1497_p8 = pnand %p1798_p7, %p58_p5 }
  0x1f   : > { %s1501_s6 = scalar_lea.sflag [#allocation4], %s142_s5 }
  0x20   : > { %p1121_p10 = pneg %p1497_p8 }
  0x24   : > { %s1493_s2 = scalar_lea.hbm %s1821_s0, %s770_s28  ;;  %s1124_s28 = scalar_lea.hbm %s1821_s0, 4096 }
  0x25   : > { %s1119_s7 = scalar_lea.hbm %s1493_s2, 1024  ;;  %p1125_p13 = scmp.lt.u32.totalorder %s1493_s2, %s1821_s0 }
  0x26   : > { %p1120_p9 = scmp.ne.s32.totalorder %s1493_s2, %s1119_s7  ;;  %p1126_p1 = scmp.lt.u32.totalorder %s1124_s28, %s1119_s7 }
  0x27   : > { %p1128_p5 = scmp.lt.u32.totalorder %s1119_s7, %s1493_s2 }
  0x28   : > { %p1122_p11 = pnand %p1121_p10, %p1120_p9  ;;  %p1127_p3 = por %p1126_p1, %p1125_p13 }
  0x2a   : > { %p1123_p12 = pneg %p1122_p11  ;;  %p1129_p7 = por %p1128_p5, %p1127_p3 }
  0x2c   : > { %p1130_p2 = pnand %p1129_p7, %p1123_p12 }
  0x2e   : > { %1133 = shalt.err (!%p1130_p2)
}
  0x2f   : > { %s1134_s5 = scalar_lea.vmem %s1488_s29, 1024  ;;  %s1347_s25 = smov [#allocation3]  }
  0x30   : > { %p1135_p9 = scmp.ne.s32.totalorder %s1488_s29, %s1134_s5  ;;  %s1139_s26 = sshll.u32 %s1347_s25, 4  ;;  %s1140_s26 = int_to_ptr.vmem [resolvable:$false] %s1139_s26 }
  0x31   : > { %s1141_s8 = scalar_lea.vmem %s1140_s26, 2048  ;;  %p1142_p4 = scmp.lt.s32.totalorder %s1488_s29, %s1140_s26 }
  0x32   : > { %p1137_p11 = pnand %p1135_p9, %p1121_p10  ;;  %p1143_p13 = scmp.lt.s32.totalorder %s1141_s8, %s1134_s5 }
  0x34   : > { %p1138_p6 = pneg %p1137_p11  ;;  %p1144_p1 = por %p1143_p13, %p1142_p4 }
  0x36   : > { %p1145_p3 = pnand %p1144_p1, %p1138_p6 }
  0x38   : > { %1148 = shalt.err (!%p1145_p3)
}
  0x39   : > { %s1802_s7 = smov 128   ;;  %s1803_s28 = smov 64  }
  0x3a   : > { %s1804_s15 = smov 4   ;;  %p775_p2 = scmp.ge.s32.totalorder %s1345_s24, 1 }
  0x3b   : > { %958 = dma.hbm_to_vmem [thread:$0]  (!%p1497_p8), %s1493_s2, 1024, %s1488_s29, %s1501_s6, %s1802_s7, %s1803_s28, %s1804_s15  }
  0x3c   : > { %p186_p4 = scmp.lt.s32.totalorder %s1345_s24, 9  ;;  %s1823_s5 = sadd.s32 4294967295, %s1345_s24  }
  0x3d   : > { %p1536_p6 = scmp.eq.s32.totalorder %s1823_s5, 7  ;;  %s764_s19 = sadd.s32 4294967294, %s1345_s24  }
  0x3e   : > { %p1540_p7 = pnand %p775_p2, %p186_p4  ;;  %s36_s8 = sadd.s32 1, %s1337_s22 }
  0x3f   : > { %s1870_s8 = smov (!%p1452_p0, %s36_s8), %s1337_s22  ;;  %s77_s2 = sadd.s32 1, %s1305_s14 }
  0x40   : > { %p90_p8 = scmp.ne.s32.totalorder %s1301_s13, %s1297_s12  ;;  %p38_p10 = scmp.ge.s32.totalorder %s1870_s8, 2 }
  0x41   : > { %p84_p12 = scmp.ne.s32.totalorder %s1305_s14, %s1301_s13  ;;  %p1826_p5 = scmp.ne.s32.totalorder %s1819_s30, 0 }
  0x42   : > { %s105_s6 = sadd.s32 1, %s1293_s11  ;;  %s1872_s8 = smov (%p38_p10, %s1870_s8), 0 }
  0x43   : > { %p1556_p9 = por %p90_p8, %p1826_p5  ;;  %1828 = sst [smem:[#allocation15_spill]] %s1872_s8 }
  0x44   : > { %s1829_s5 = sadd.s32 1, %s1341_s23  ;;  %s73_s27 = ssub.s32 %s1337_s22, %s1872_s8 }
  0x45   : > { %s1827_s29 = scalar_select %p1556_p9, 1, 0 }
  0x46   : > { %s1874_s5 = smov (!%p38_p10, %s1829_s5), %s1341_s23  ;;  %p115_p0 = scmp.ne.s32.totalorder %s1293_s11, %s1289_s10 }
  0x47   : > { %p42_p11 = scmp.ge.s32.totalorder %s1874_s5, 2  ;;  %s74_s12 = sor.u32 %s73_s27, %s1474_s3 }
  0x48   : > { %p75_p13 = scmp.eq.s32.totalorder %s74_s12, 0  ;;  %p1573_p1 = por %p1536_p6, %p115_p0 }
  0x49   : > { %s1876_s5 = smov (%p42_p11, %s1874_s5), 0  ;;  %p121_p3 = scmp.ne.s32.totalorder %s1289_s10, %s1285_s9 }
  0x4a   : > { %s1830_s30 = scalar_select %p1573_p1, 1, 0 }
  0x4b   : > { %1832 = sst [smem:[#allocation17_spill]] %s1876_s5  ;;  %s44_s28 = ssub.s32 %s1341_s23, %s1876_s5 }
  0x4c   : > { %1831 = sst [smem:[#allocation16_spill]] %s1830_s30  ;;  %s46_s15 = sor.u32 %s1474_s3, %s44_s28 }
  0x4d   : > { %s1580_s7 = scalar_select %p75_p13, %s1305_s14, %s77_s2  }
  0x4e   : > { %s102_s0 = sor.u32 %s73_s27, %s44_s28  ;;  %p47_p2 = scmp.eq.s32.totalorder %s46_s15, 0 }
  0x4f   : > { %p103_p4 = scmp.eq.s32.totalorder %s102_s0, 0  ;;  %p122_p8 = scmp.eq.s32.totalorder %s764_s19, 7 }
  0x50   : > { %s165_s25 = sand.u32 1, %s1305_s14   ;;  %s1833_s12 = sadd.s32 1, %s1317_s17 }
  0x51   : > { %s1591_s8 = scalar_select %p47_p2, %s1317_s17, %s1833_s12  }
  0x52   : > { %s1594_s30 = scalar_select %p103_p4, %s1293_s11, %s105_s6  }
  0x53   : > { %p1834_p6 = scmp.eq.s32.totalorder %s1345_s24, 0  ;;  %p1601_p5 = por %p122_p8, %p121_p3 }
  0x54   : > { %s771_s5 = sshll.u32 %s165_s25, 6  ;;  %s820_s3 = sshll.u32 %s1333_s21, 5 }
  0x55   : > { %p86_p10 = por %p84_p12, %p1834_p6  ;;  %s175_s28 = sadd.s32 %s1337_s22, %s820_s3 }
  0x56   : > { %s1835_s2 = scalar_select %p1601_p5, 1, 0 }
  0x57   : > { %s774_s15 = sshll.u32 %s175_s28, 6  ;;  %s169_s27 = scalar_lea.vmem [#allocation6], %s771_s5 }
  0x58   : > { %s178_s0 = sshll.u32 %s169_s27, 4  ;;  %s1836_s1 = sld [smem:[#allocation19_spill]]  ;;  %s1612_s0 = int_to_ptr.vmem [resolvable:$true] %s178_s0 }
  0x59   : > { %p1837_p12 = scmp.lt.s32.totalorder %s1345_s24, 8  ;;  %s1620_s5 = scalar_lea.sflag [#allocation7], %s165_s25 }
  0x5b   : > { %p1616_p0 = pnand %p1837_p12, %p86_p10 }
  0x5d   : > { %p1151_p13 = pneg %p1616_p0 }
  0x5e   : > { %s1610_s12 = scalar_lea.hbm %s1836_s1, %s774_s15  ;;  %s1154_s15 = scalar_lea.hbm %s1836_s1, 4096 }
  0x5f   : > { %s1149_s3 = scalar_lea.hbm %s1610_s12, 1024  ;;  %p1155_p4 = scmp.lt.u32.totalorder %s1610_s12, %s1836_s1 }
  0x60   : > { %p1150_p11 = scmp.ne.s32.totalorder %s1610_s12, %s1149_s3  ;;  %p1156_p8 = scmp.lt.u32.totalorder %s1154_s15, %s1149_s3 }
  0x61   : > { %p1158_p10 = scmp.lt.u32.totalorder %s1149_s3, %s1610_s12 }
  0x62   : > { %p1152_p3 = pnand %p1151_p13, %p1150_p11  ;;  %p1157_p6 = por %p1156_p8, %p1155_p4 }
  0x64   : > { %p1153_p2 = pneg %p1152_p3  ;;  %p1159_p12 = por %p1158_p10, %p1157_p6 }
  0x66   : > { %p1160_p5 = pnand %p1159_p12, %p1153_p2 }
  0x68   : > { %1163 = shalt.err (!%p1160_p5)
}
  0x69   : > { %s1164_s25 = scalar_lea.vmem %s1612_s0, 1024  ;;  %s1351_s23 = smov [#allocation6]  }
  0x6a   : > { %p1165_p11 = scmp.ne.s32.totalorder %s1612_s0, %s1164_s25  ;;  %s1169_s28 = sshll.u32 %s1351_s23, 4  ;;  %s1170_s28 = int_to_ptr.vmem [resolvable:$false] %s1169_s28 }
  0x6b   : > { %s1171_s27 = scalar_lea.vmem %s1170_s28, 2048  ;;  %p1172_p9 = scmp.lt.s32.totalorder %s1612_s0, %s1170_s28 }
  0x6c   : > { %p1167_p3 = pnand %p1165_p11, %p1151_p13  ;;  %p1173_p4 = scmp.lt.s32.totalorder %s1171_s27, %s1164_s25 }
  0x6e   : > { %p1168_p1 = pneg %p1167_p3  ;;  %p1174_p8 = por %p1173_p4, %p1172_p9 }
  0x70   : > { %p1175_p6 = pnand %p1174_p8, %p1168_p1 }
  0x72   : > { %1178 = shalt.err (!%p1175_p6)
}
  0x73   : > { %s1839_s3 = smov 4   ;;  %s1840_s15 = smov 64  }
  0x74   : > { %s1841_s19 = smov 128   ;;  %190 = sbr.rel (%p1540_p7) target bundleno = 437 (0x1b5), region = 28 }
  0x75   : > { %961 = dma.hbm_to_vmem [thread:$0]  (!%p1616_p0), %s1610_s12, 1024, %s1612_s0, %s1620_s5, %s1841_s19, %s1840_s15, %s1839_s3  }
  0x76   : > { %s192_s23 = sand.u32 (!%p1540_p7), 1, %s1313_s16   ;;  %p1842_p9 = scmp.ne.s32.totalorder (!%p1540_p7), %s1820_s4, 0 }
  0x77   : > { %s776_s28 = sshll.u32 (!%p1540_p7), %s192_s23, 6  ;;  %s193_s25 = scalar_lea.sflag (!%p1540_p7), [#allocation4], %s192_s23 }
  0x78   : > { %s1654_s27 = scalar_lea.vmem (!%p1540_p7), [#allocation3], %s776_s28 }
  0x7b   : > { %1272 = dma.done.wait (%p1842_p9), %s193_s25, 1024  }
  0x7c   : > { %1274 = vsyncadd (%p1842_p9), %s193_s25, 4294966272  ;;  %s201_s6 = sand.u32 1, %s1301_s13   ;;  %p1843_p7 = scmp.ne.s32.totalorder %s1827_s29, 0 }
  0x7d   : > { %s777_s1 = sshll.u32 %s201_s6, 6  ;;  %s202_s0 = scalar_lea.sflag [#allocation7], %s201_s6 }
  0x7e   : > { %s1661_s12 = scalar_lea.vmem [#allocation6], %s777_s1 }
  0x7f   : > { %1276 = dma.done.wait (%p1843_p7), %s202_s0, 1024  }
  0x80   : > { %1278 = vsyncadd (%p1843_p7), %s202_s0, 4294966272  ;;  %s228_s26 = sand.u32 1, %s1289_s10   ;;  %p779_p1 = scmp.ne.s32.totalorder %s1321_s18, 0 }
  0x81   : > { %s778_s5 = sshll.u32 %s228_s26, 6  ;;  %v1352_v0 = vmov (!%p779_p1), 0.0  }
  0x82   : > { %s1670_s3 = scalar_lea.vmem [#allocation8], %s778_s5  ;;  %238 = sbr.rel (%p779_p1) target bundleno = 138 (0x8a), region = 40  ;;  %239 = vst [vmem:[#allocation2] sm:$0xff] (!%p779_p1), %v1352_v0  ;;  %240 = vst [vmem:[#allocation2 + $0x8] sm:$0xff] (!%p779_p1), %v1352_v0 }
  0x83   : > { %241 = vst [vmem:[#allocation2 + $0x10] sm:$0xff] (!%p779_p1), %v1352_v0  ;;  %242 = vst [vmem:[#allocation2 + $0x18] sm:$0xff] (!%p779_p1), %v1352_v0 }
  0x84   : > { %243 = vst [vmem:[#allocation2 + $0x20] sm:$0xff] (!%p779_p1), %v1352_v0  ;;  %244 = vst [vmem:[#allocation2 + $0x28] sm:$0xff] (!%p779_p1), %v1352_v0 }
  0x85   : > { %245 = vst [vmem:[#allocation2 + $0x30] sm:$0xff] (!%p779_p1), %v1352_v0  ;;  %246 = vst [vmem:[#allocation2 + $0x38] sm:$0xff] (!%p779_p1), %v1352_v0 }
  0x86   : > { %247 = vst [vmem:[#allocation2 + $0x40] sm:$0xff] (!%p779_p1), %v1352_v0  ;;  %248 = vst [vmem:[#allocation2 + $0x48] sm:$0xff] (!%p779_p1), %v1352_v0 }
  0x87   : > { %249 = vst [vmem:[#allocation2 + $0x50] sm:$0xff] (!%p779_p1), %v1352_v0  ;;  %250 = vst [vmem:[#allocation2 + $0x58] sm:$0xff] (!%p779_p1), %v1352_v0 }
  0x88   : > { %251 = vst [vmem:[#allocation2 + $0x60] sm:$0xff] (!%p779_p1), %v1352_v0  ;;  %252 = vst [vmem:[#allocation2 + $0x68] sm:$0xff] (!%p779_p1), %v1352_v0 }
  0x89   : > { %253 = vst [vmem:[#allocation2 + $0x70] sm:$0xff] %v1352_v0  ;;  %254 = vst [vmem:[#allocation2 + $0x78] sm:$0xff] %v1352_v0 }
  0x8a PF: > { %v1103_v1 = vld [vmem:[%s1661_s12] sm:$0xff]   ;;  %v1104_v2 = vld [vmem:[%s1661_s12 + $0x8] sm:$0xff]   ;;  %v1105_v3 = vld [vmem:[%s1661_s12 + $0x10] sm:$0xff]   ;;  %p796_p5 = scmp.ne.s32.totalorder %s1321_s18, 1 }
  0x8b   : > { %901 = vmatprep.subr.bf16.mxu0 %v1103_v1  ;;  %933 = vmatprep.subr.bf16.mxu1 %v1103_v1  ;;  %v1106_v4 = vld [vmem:[%s1661_s12 + $0x18] sm:$0xff]   ;;  %v1111_v5 = vld [vmem:[%s1654_s27] sm:$0xff]   ;;  %v1108_v8 = vld [vmem:[%s1661_s12 + $0x28] sm:$0xff]  }
  0x8c   : > { %902 = vmatpush3.bf16.msra.mxu0 %v1103_v1  ;;  %941 = vmatpush3.bf16.msra.mxu1 %v1103_v1  ;;  %v1112_v6 = vld [vmem:[%s1654_s27 + $0x20] sm:$0xff]   ;;  %v1109_v9 = vld [vmem:[%s1661_s12 + $0x30] sm:$0xff]   ;;  %v1110_v10 = vld [vmem:[%s1661_s12 + $0x38] sm:$0xff]  }
  0x8d   : > { %903 = vmatprep.subr.bf16.mxu0 %v1104_v2  ;;  %934 = vmatprep.subr.bf16.mxu1 %v1104_v2  ;;  %v1107_v7 = vld [vmem:[%s1661_s12 + $0x20] sm:$0xff]   ;;  %v1113_v11 = vld [vmem:[%s1654_s27 + $0x8] sm:$0xff]   ;;  %v1115_v13 = vld [vmem:[%s1654_s27 + $0x10] sm:$0xff]  }
  0x8e   : > { %917 = vmatprep.mubr.bf16.mxu0 %v1111_v5  ;;  %925 = vmatprep.mubr.bf16.mxu1 %v1112_v6  ;;  %v1114_v12 = vld [vmem:[%s1654_s27 + $0x28] sm:$0xff]   ;;  %v1116_v14 = vld [vmem:[%s1654_s27 + $0x30] sm:$0xff]   ;;  %v1117_v15 = vld [vmem:[%s1654_s27 + $0x18] sm:$0xff]  }
  0x8f   : > { %v1118_v16 = vld [vmem:[%s1654_s27 + $0x38] sm:$0xff]   ;;  %v257_v17 = vld [vmem:[#allocation2 + $0x10] sm:$0xff]  ;;  %v255_v19 = vld [vmem:[#allocation2] sm:$0xff] }
  0x90   : > { %904 = vmatpush3.bf16.msra.mxu0 %v1104_v2  ;;  %942 = vmatpush3.bf16.msra.mxu1 %v1104_v2  ;;  %v265_v18 = vld [vmem:[#allocation2 + $0x50] sm:$0xff]  ;;  %v263_v20 = vld [vmem:[#allocation2 + $0x40] sm:$0xff]  ;;  %v258_v23 = vld [vmem:[#allocation2 + $0x18] sm:$0xff] }
  0x91   : > { %905 = vmatprep.subr.bf16.mxu0 %v1105_v3  ;;  %935 = vmatprep.subr.bf16.mxu1 %v1105_v3  ;;  %v266_v24 = vld [vmem:[#allocation2 + $0x58] sm:$0xff]  ;;  %v256_v29 = vld [vmem:[#allocation2 + $0x8] sm:$0xff]  ;;  %v261_v41 = vld [vmem:[#allocation2 + $0x30] sm:$0xff] }
  0x92   : > { %v264_v30 = vld [vmem:[#allocation2 + $0x48] sm:$0xff]  ;;  %v269_v42 = vld [vmem:[#allocation2 + $0x70] sm:$0xff]  ;;  %v259_v43 = vld [vmem:[#allocation2 + $0x20] sm:$0xff] }
  0x93   : > { %v267_v44 = vld [vmem:[#allocation2 + $0x60] sm:$0xff]  ;;  %v262_v47 = vld [vmem:[#allocation2 + $0x38] sm:$0xff]  ;;  %v260_v53 = vld [vmem:[#allocation2 + $0x28] sm:$0xff] }
  0x94   : > { %906 = vmatpush3.bf16.msra.mxu0 %v1105_v3  ;;  %943 = vmatpush3.bf16.msra.mxu1 %v1105_v3  ;;  %v270_v48 = vld [vmem:[#allocation2 + $0x78] sm:$0xff]  ;;  %v268_v54 = vld [vmem:[#allocation2 + $0x68] sm:$0xff] }
  0x95   : > { %907 = vmatprep.subr.bf16.mxu0 %v1106_v4  ;;  %936 = vmatprep.subr.bf16.mxu1 %v1106_v4 }
  0x98   : > { %908 = vmatpush3.bf16.msra.mxu0 %v1106_v4  ;;  %944 = vmatpush3.bf16.msra.mxu1 %v1106_v4 }
  0x99   : > { %909 = vmatprep.subr.bf16.mxu0 %v1107_v7  ;;  %937 = vmatprep.subr.bf16.mxu1 %v1107_v7 }
  0x9c   : > { %910 = vmatpush3.bf16.msra.mxu0 %v1107_v7  ;;  %945 = vmatpush3.bf16.msra.mxu1 %v1107_v7 }
  0x9d   : > { %911 = vmatprep.subr.bf16.mxu0 %v1108_v8  ;;  %938 = vmatprep.subr.bf16.mxu1 %v1108_v8 }
  0xa0   : > { %912 = vmatpush3.bf16.msra.mxu0 %v1108_v8  ;;  %946 = vmatpush3.bf16.msra.mxu1 %v1108_v8 }
  0xa1   : > { %913 = vmatprep.subr.bf16.mxu0 %v1109_v9  ;;  %939 = vmatprep.subr.bf16.mxu1 %v1109_v9 }
  0xa4   : > { %914 = vmatpush3.bf16.msra.mxu0 %v1109_v9  ;;  %947 = vmatpush3.bf16.msra.mxu1 %v1109_v9 }
  0xa5   : > { %915 = vmatprep.subr.bf16.mxu0 %v1110_v10  ;;  %940 = vmatprep.subr.bf16.mxu1 %v1110_v10 }
  0xa8   : > { %916 = vmatpush3.bf16.msra.mxu0 %v1110_v10  ;;  %948 = vmatpush3.bf16.msra.mxu1 %v1110_v10 }
  0xab   : > { %918 = vmatmul.mubr.bf16.vlgmr.msra.gmra.mrb[0].mxu0 %v1113_v11  ;;  %926 = vmatmul.mubr.bf16.vlgmr.msra.gmra.mrb[0].mxu1 %v1114_v12 }
  0xac   : > { %921 = vmatprep.mubr.bf16.mxu0 %v1115_v13  ;;  %929 = vmatprep.mubr.bf16.mxu1 %v1116_v14 }
  0xb3   : > { %922 = vmatmul.mubr.bf16.gmra.mrb[4].mxu0 %v1117_v15  ;;  %930 = vmatmul.mubr.bf16.gmra.mrb[4].mxu1 %v1118_v16 }
 0x17e   : > { %v919_v21 = vpop.f32.mrb[0].mxu0  ;;  %v927_v22 = vpop.f32.mrb[0].mxu1 }
 0x17f   : > { %v498_v25 = vadd.f32 %v919_v21, %v257_v17  ;;  %v506_v26 = vadd.f32 %v927_v22, %v265_v18  ;;  %v433_v27 = vpop.f32.mrb[1].mxu0  ;;  %v465_v28 = vpop.f32.mrb[1].mxu1 }
 0x180   : > { %v496_v31 = vadd.f32 %v433_v27, %v255_v19  ;;  %v504_v32 = vadd.f32 %v465_v28, %v263_v20  ;;  %v920_v33 = vpop.f32.mrb[2].mxu0  ;;  %v928_v34 = vpop.f32.mrb[2].mxu1 }
 0x181   : > { %514 = vst [vmem:[#allocation2 + $0x10] sm:$0xff] %v498_v25  ;;  %522 = vst [vmem:[#allocation2 + $0x50] sm:$0xff] %v506_v26  ;;  %v499_v35 = vadd.f32 %v920_v33, %v258_v23  ;;  %v507_v36 = vadd.f32 %v928_v34, %v266_v24  ;;  %v436_v37 = vpop.f32.mrb[3].mxu0  ;;  %v468_v38 = vpop.f32.mrb[3].mxu1 }
 0x182   : > { %512 = vst [vmem:[#allocation2] sm:$0xff] %v496_v31  ;;  %520 = vst [vmem:[#allocation2 + $0x40] sm:$0xff] %v504_v32  ;;  %v497_v39 = vadd.f32 %v436_v37, %v256_v29  ;;  %v505_v40 = vadd.f32 %v468_v38, %v264_v30 }
 0x183   : > { %515 = vst [vmem:[#allocation2 + $0x18] sm:$0xff] %v499_v35  ;;  %523 = vst [vmem:[#allocation2 + $0x58] sm:$0xff] %v507_v36 }
 0x184   : > { %513 = vst [vmem:[#allocation2 + $0x8] sm:$0xff] %v497_v39  ;;  %521 = vst [vmem:[#allocation2 + $0x48] sm:$0xff] %v505_v40 }
 0x186   : > { %v923_v45 = vpop.f32.mrb[4].mxu0  ;;  %v931_v46 = vpop.f32.mrb[4].mxu1  ;;  %531 = sbr.rel (%p796_p5) target bundleno = 408 (0x198), region = 44 }
 0x187   : > { %v502_v49 = vadd.f32 %v923_v45, %v261_v41  ;;  %v510_v50 = vadd.f32 %v931_v46, %v269_v42  ;;  %v449_v51 = vpop.f32.mrb[5].mxu0  ;;  %v481_v52 = vpop.f32.mrb[5].mxu1 }
 0x188   : > { %v500_v55 = vadd.f32 %v449_v51, %v259_v43  ;;  %v508_v56 = vadd.f32 %v481_v52, %v267_v44  ;;  %v924_v57 = vpop.f32.mrb[6].mxu0  ;;  %v932_v58 = vpop.f32.mrb[6].mxu1  ;;  %v534_v3 = vld [vmem:[#allocation2 + $0x10] sm:$0xff] (!%p796_p5) }
 0x189   : > { %518 = vst [vmem:[#allocation2 + $0x30] sm:$0xff] %v502_v49  ;;  %526 = vst [vmem:[#allocation2 + $0x70] sm:$0xff] %v510_v50  ;;  %v503_v59 = vadd.f32 %v924_v57, %v262_v47  ;;  %v511_v60 = vadd.f32 %v932_v58, %v270_v48  ;;  %v452_v61 = vpop.f32.mrb[7].mxu0  ;;  %v484_v62 = vpop.f32.mrb[7].mxu1  ;;  %v532_v1 = vld [vmem:[#allocation2] sm:$0xff] (!%p796_p5)  ;;  %v542_v15 = vld [vmem:[#allocation2 + $0x50] sm:$0xff] (!%p796_p5) }
 0x18a   : > { %516 = vst [vmem:[#allocation2 + $0x20] sm:$0xff] %v500_v55  ;;  %524 = vst [vmem:[#allocation2 + $0x60] sm:$0xff] %v508_v56  ;;  %v501_v63 = vadd.f32 %v452_v61, %v260_v53  ;;  %v509_v0 = vadd.f32 %v484_v62, %v268_v54  ;;  %v535_v5 = vld [vmem:[#allocation2 + $0x18] sm:$0xff] (!%p796_p5)  ;;  %v540_v12 = vld [vmem:[#allocation2 + $0x40] sm:$0xff] (!%p796_p5) }
 0x18b   : > { %519 = vst [vmem:[#allocation2 + $0x38] sm:$0xff] %v503_v59  ;;  %527 = vst [vmem:[#allocation2 + $0x78] sm:$0xff] %v511_v60  ;;  %v533_v2 = vld [vmem:[#allocation2 + $0x8] sm:$0xff] (!%p796_p5)  ;;  %v846_v8 = vpack.c.bf16 (!%p796_p5), %v535_v5, %v534_v3  ;;  %v543_v16 = vld [vmem:[#allocation2 + $0x58] sm:$0xff] (!%p796_p5) }
 0x18c   : > { %517 = vst [vmem:[#allocation2 + $0x28] sm:$0xff] %v501_v63  ;;  %525 = vst [vmem:[#allocation2 + $0x68] sm:$0xff] %v509_v0  ;;  %v841_v4 = vpack.c.bf16 (!%p796_p5), %v533_v2, %v532_v1  ;;  %v541_v14 = vld [vmem:[#allocation2 + $0x48] sm:$0xff] (!%p796_p5)  ;;  %v866_v18 = vpack.c.bf16 (!%p796_p5), %v543_v16, %v542_v15 }
 0x18d   : > { %878 = vst [vmem:[%s1670_s3 + $0x8] sm:$0xff] %v846_v8   ;;  %v861_v17 = vpack.c.bf16 %v541_v14, %v540_v12 }
 0x18e   : > { %842 = vst [vmem:[%s1670_s3] sm:$0xff] %v841_v4   ;;  %882 = vst [vmem:[%s1670_s3 + $0x28] sm:$0xff] %v866_v18  }
 0x18f   : > { %881 = vst [vmem:[%s1670_s3 + $0x20] sm:$0xff] %v861_v17  }
 0x190   : > { %v538_v10 = vld [vmem:[#allocation2 + $0x30] sm:$0xff] }
 0x191   : > { %v536_v6 = vld [vmem:[#allocation2 + $0x20] sm:$0xff]  ;;  %v546_v21 = vld [vmem:[#allocation2 + $0x70] sm:$0xff] }
 0x192   : > { %v539_v11 = vld [vmem:[#allocation2 + $0x38] sm:$0xff]  ;;  %v544_v19 = vld [vmem:[#allocation2 + $0x60] sm:$0xff] }
 0x193   : > { %v537_v7 = vld [vmem:[#allocation2 + $0x28] sm:$0xff]  ;;  %v856_v13 = vpack.c.bf16 %v539_v11, %v538_v10  ;;  %v547_v23 = vld [vmem:[#allocation2 + $0x78] sm:$0xff] }
 0x194   : > { %v851_v9 = vpack.c.bf16 %v537_v7, %v536_v6  ;;  %v545_v20 = vld [vmem:[#allocation2 + $0x68] sm:$0xff]  ;;  %v876_v24 = vpack.c.bf16 %v547_v23, %v546_v21 }
 0x195   : > { %880 = vst [vmem:[%s1670_s3 + $0x18] sm:$0xff] %v856_v13   ;;  %v871_v22 = vpack.c.bf16 %v545_v20, %v544_v19 }
 0x196   : > { %879 = vst [vmem:[%s1670_s3 + $0x10] sm:$0xff] %v851_v9   ;;  %884 = vst [vmem:[%s1670_s3 + $0x38] sm:$0xff] %v876_v24  }
 0x197   : > { %883 = vst [vmem:[%s1670_s3 + $0x30] sm:$0xff] %v871_v22  }
 0x198 PF: > { %s1844_s1 = sld [smem:[#allocation12_spill]]  ;;  %s1845_s18 = sld [smem:[#allocation16_spill]] }
 0x199   : > { %s837_s4 = sshll.u32 %s1329_s20, 5  ;;  %s644_s15 = sshll.u32 %s1670_s3, 4  ;;  %s1701_s15 = int_to_ptr.vmem [resolvable:$true] %s644_s15 }
 0x19a   : > { %s1846_s25 = sld [smem:[#allocation20_spill]]  ;;  %s1710_s6 = scalar_lea.sflag [#allocation5], %s228_s26 }
 0x19b   : > { %s1179_s0 = scalar_lea.vmem %s1701_s15, 1024  ;;  %s1353_s20 = smov [#allocation8]  }
 0x19c   : > { %p1180_p0 = scmp.ne.s32.totalorder %s1701_s15, %s1179_s0  ;;  %s1183_s12 = sshll.u32 %s1353_s20, 4  ;;  %s1184_s12 = int_to_ptr.vmem [resolvable:$false] %s1183_s12 }
 0x19d   : > { %s1185_s5 = scalar_lea.vmem %s1184_s12, 2048  ;;  %p1186_p12 = scmp.lt.s32.totalorder %s1701_s15, %s1184_s12 }
 0x19e   : > { %s641_s29 = sadd.s32 %s1844_s1, %s837_s4  ;;  %p1847_p13 = scmp.ne.s32.totalorder %s1845_s18, 0 }
 0x19f   : > { %s816_s19 = sshll.u32 %s641_s29, 6  ;;  %p1187_p11 = scmp.lt.s32.totalorder %s1185_s5, %s1179_s0 }
 0x1a0   : > { %s1706_s27 = scalar_lea.hbm %s1846_s25, %s816_s19  ;;  %p1181_p2 = pnand %p1180_p0, %p1847_p13 }
 0x1a1   : > { %p1188_p3 = por %p1187_p11, %p1186_p12 }
 0x1a2   : > { %p1182_p10 = pneg %p1181_p2 }
 0x1a4   : > { %p1189_p4 = pnand %p1188_p3, %p1182_p10 }
 0x1a6   : > { %1192 = shalt.err (!%p1189_p4)
}
 0x1a7   : > { %s1193_s26 = scalar_lea.hbm %s1706_s27, 1024  ;;  %s1197_s4 = scalar_lea.hbm %s1846_s25, 4096 }
 0x1a8   : > { %p1194_p8 = scmp.ne.s32.totalorder %s1706_s27, %s1193_s26  ;;  %p1198_p7 = scmp.lt.u32.totalorder %s1706_s27, %s1846_s25 }
 0x1a9   : > { %p1199_p1 = scmp.lt.u32.totalorder %s1197_s4, %s1193_s26  ;;  %p1201_p0 = scmp.lt.u32.totalorder %s1193_s26, %s1706_s27 }
 0x1aa   : > { %p1195_p6 = pnand %p1194_p8, %p1847_p13 }
 0x1ab   : > { %p1200_p5 = por %p1199_p1, %p1198_p7 }
 0x1ac   : > { %p1196_p9 = pneg %p1195_p6 }
 0x1ad   : > { %p1202_p2 = por %p1201_p0, %p1200_p5 }
 0x1af   : > { %p1203_p10 = pnand %p1202_p2, %p1196_p9 }
 0x1b1   : > { %1206 = shalt.err (!%p1203_p10)
}
 0x1b2   : > { %s1354_s23 = smov 64   ;;  %s1355_s28 = smov 128  }
 0x1b3   : > { %s1356_s0 = smov 4  }
 0x1b4   : > { %953 = dma.vmem_to_hbm [thread:$0]  (%p1847_p13), %s1701_s15, 1024, %s1706_s27, %s1710_s6, %s1354_s23, %s1355_s28, %s1356_s0  }
 0x1b5 PF: > { %p967_p12 = scmp.ge.s32.totalorder %s1345_s24, 2  ;;  %s659_s20 = sand.u32 1, %s1285_s9  }
 0x1b6   : > { %p1848_p11 = scmp.ne.s32.totalorder %s1835_s2, 0  ;;  %s660_s12 = scalar_lea.sflag [#allocation5], %s659_s20 }
 0x1b8   : > { %p963_p3 = pnand %p967_p12, %p1848_p11 }
 0x1ba   : > { %1280 = dma.done.wait (!%p963_p3), %s660_s12, 1024  }
 0x1bb   : > { %1282 = vsyncadd (!%p963_p3), %s660_s12, 4294966272  ;;  %s21_s24 = sadd.s32 1, %s1345_s24   ;;  %s1850_s20 = sld [smem:[#allocation13_spill]] }
 0x1bc   : > { %p1739_p4 = scmp.ge.s32.totalorder %s21_s24, 10   ;;  %s1851_s2 = sld [smem:[#allocation14_spill]] }
 0x1bd   : > { %s1852_s27 = sld [smem:[#allocation15_spill]]  ;;  %s1853_s23 = sld [smem:[#allocation17_spill]] }
 0x1be   : > { %s1854_s9 = smov %s1289_s10  ;;  %s1855_s10 = smov %s1293_s11 }
 0x1bf   : > { %s1856_s11 = smov %s1594_s30  ;;  %s1857_s12 = smov %s1301_s13 }
 0x1c0   : > { %s1858_s13 = smov %s1305_s14  ;;  %s1859_s14 = smov %s1580_s7 }
 0x1c1   : > { %s1860_s15 = smov %s1313_s16  ;;  %s1861_s16 = smov %s1317_s17 }
 0x1c2   : > { %s1862_s17 = smov %s1591_s8  ;;  %s1863_s18 = smov %s1333_s21 }
 0x1c3   : > { %s1864_s19 = smov %s1337_s22  ;;  %s1865_s21 = smov %s1851_s2 }
 0x1c4   : > { %s1866_s22 = smov %s1852_s27  ;;  %20 = sbr.rel (!%p1739_p4) target bundleno = 17 (0x11), region = 94 }
 0x1cb   :  { %665 = vsyncpa [#allocation4], 1 }
 0x1cc   :  { %667 = vsyncpa [#allocation4 + $0x1], 1 }
 0x1cd   :  { %668 = vsyncpa [#allocation7], 1 }
 0x1ce   :  { %670 = vsyncpa [#allocation7 + $0x1], 1 }
 0x1cf   :  { %671 = vsyncpa [#allocation5], 1 }
 0x1d0   :  { %673 = vsyncpa [#allocation5 + $0x1], 1 }

</bundles_post_ra>
